<compile_context>
chip_gen: v6e
topology: v6e:2x2x1
jax: 0.10.0
libtpu: 0.0.40
codegen_flags: <defaults>
</compile_context>

<pallas_src>
import math

import jax
import jax.numpy as jnp
from jax.experimental import pallas as pl
from jax.experimental.pallas import tpu as pltpu

LANE = 128
# Widest-first lane widths: wide unmasked vst + long contiguous DMA rows.
_LANE_CANDIDATES = (32768, 16384, 8192, 4096, 2048, 1024, 512, 256, 128)
_MULTI_CHUNK_BYTES = 2 * 1024 * 1024   # ragged copies above this use overlapped DMAs
_MAX_DMA_CHUNKS = 4


def _sublanes_for(dtype):
    # Native sublane packing: 8 rows for 32-bit, 16 for 16-bit, 32 for 8-bit.
    return {4: 8, 2: 16, 1: 32}.get(jnp.dtype(dtype).itemsize, 8)


def _vmem_capacity_bytes():
    try:
        return int(pltpu.get_tpu_info().vmem_capacity_bytes)
    except Exception:
        return 128 * 1024 * 1024  # conservative default (v5e/v6e)


def _target_block_bytes(vmem_cap):
    # v5e / v6e (128 MiB VMEM): 16 MiB per-buffer blocks; v7x (64 MiB): 4 MiB.
    return 16 * 1024 * 1024 if vmem_cap >= 96 * 1024 * 1024 else 4 * 1024 * 1024


def _resolve_shape(numel, shape):
    """Resolve a torch.view-style shape (may contain a single -1)."""
    shape = list(shape)
    if shape.count(-1) > 1:
        raise ValueError("only one dimension can be inferred (-1)")
    if -1 in shape:
        known = 1
        for s in shape:
            if s != -1:
                known *= s
        if known == 0 or numel % known != 0:
            raise ValueError(f"shape {tuple(shape)} is invalid for input of size {numel}")
        shape[shape.index(-1)] = numel // known
    if math.prod(shape) != numel:
        raise ValueError(f"shape {tuple(shape)} is invalid for input of size {numel}")
    return tuple(shape)


# ---------------------------------------------------------------------------
# Path A: lane-aligned payload -> pipelined VMEM copy over a wide 2D slab.
# ---------------------------------------------------------------------------
def _copy_kernel(x_ref, o_ref):
    # Identity copy of the current (block_rows, C) tile.
    o_ref[...] = x_ref[...]


def _copy_slab(slab, block_rows, vmem_limit):
    R, C = slab.shape
    itemsize = jnp.dtype(slab.dtype).itemsize
    return pl.pallas_call(
        _copy_kernel,
        out_shape=jax.ShapeDtypeStruct((R, C), slab.dtype),
        grid_spec=pltpu.PrefetchScalarGridSpec(
            num_scalar_prefetch=0,
            grid=(pl.cdiv(R, block_rows),),
            in_specs=[pl.BlockSpec((block_rows, C), lambda i: (i, 0))],
            out_specs=pl.BlockSpec((block_rows, C), lambda i: (i, 0)),
        ),
        compiler_params=pltpu.CompilerParams(
            # TODO(synk): on v7x, pltpu.CORE_PARALLEL here would drive the copy
            # from both TensorCores; kept "parallel" for cross-gen portability.
            dimension_semantics=("parallel",),
            vmem_limit_bytes=vmem_limit,
        ),
        cost_estimate=pl.CostEstimate(
            flops=0, transcendentals=0, bytes_accessed=2 * R * C * itemsize),
    )(slab)


def _aligned_copy(flat, block_bytes=None):
    numel = flat.shape[0]
    itemsize = jnp.dtype(flat.dtype).itemsize
    sub = _sublanes_for(flat.dtype)
    vmem_cap = _vmem_capacity_bytes()
    if block_bytes is None:
        block_bytes = _target_block_bytes(vmem_cap)

    # Widest lane-dense slab width that divides numel exactly (no pad).
    C = LANE
    for cand in _LANE_CANDIDATES:
        if numel % cand == 0:
            C = cand
            break
    R = numel // C

    if R * C * itemsize <= block_bytes:
        block_rows = R                      # whole slab in a single block
    else:
        block_rows = max(sub, (block_bytes // (C * itemsize)) // sub * sub)
        block_rows = min(block_rows, R)

    actual_block_bytes = block_rows * C * itemsize
    # 2 in + 2 out double-buffered blocks + headroom, capped to 3/4 of VMEM.
    vmem_limit = min(max(24 * 1024 * 1024, 4 * actual_block_bytes + 8 * 1024 * 1024),
                     (vmem_cap * 3) // 4)
    return _copy_slab(flat.reshape(R, C), block_rows, vmem_limit)


# ---------------------------------------------------------------------------
# Path B: ragged payload -> direct HBM->HBM DMA copy (no VMEM staging,
# no padding, no (8,128) constraints).
# ---------------------------------------------------------------------------
def _ragged_dma_copy(flat):
    numel = flat.shape[0]
    itemsize = jnp.dtype(flat.dtype).itemsize
    nbytes = numel * itemsize

    # Static chunking (numel is known at trace time).  Multiple chunks let
    # several DMAs be in flight at once on large copies.
    if nbytes >= _MULTI_CHUNK_BYTES:
        chunk = -(-numel // _MAX_DMA_CHUNKS)
        chunk = -(-chunk // 512) * 512      # keep chunk starts nicely aligned
    else:
        chunk = numel
    bounds = []
    off = 0
    while off < numel:
        size = min(chunk, numel - off)
        bounds.append((off, size))
        off += size
    n_chunks = len(bounds)

    def kernel(x_ref, o_ref, sems):
        copies = []
        for i, (o, s) in enumerate(bounds):       # static Python loop
            cp = pltpu.make_async_copy(
                x_ref.at[pl.ds(o, s)],
                o_ref.at[pl.ds(o, s)],
                sems.at[i])
            cp.start()
            copies.append(cp)
        for cp in copies:
            cp.wait()

    return pl.pallas_call(
        kernel,
        out_shape=jax.ShapeDtypeStruct((numel,), flat.dtype),
        in_specs=[pl.BlockSpec(memory_space=pl.ANY)],
        out_specs=pl.BlockSpec(memory_space=pl.ANY),
        scratch_shapes=[pltpu.SemaphoreType.DMA((n_chunks,))],
        cost_estimate=pl.CostEstimate(
            flops=0, transcendentals=0, bytes_accessed=2 * nbytes),
    )(flat)


# ---------------------------------------------------------------------------
# Public wrapper: equivalent of View(shape).forward(x).
# ---------------------------------------------------------------------------
def pallas_view(x, shape, *, block_bytes=None):
    numel = x.size
    target = _resolve_shape(numel, shape)

    if numel == 0:
        return jnp.reshape(x, target)       # nothing to copy

    flat = jnp.ravel(x)                     # row-major flatten (torch contiguous)

    if numel % LANE == 0:
        out = _aligned_copy(flat, block_bytes)
    else:
        out = _ragged_dma_copy(flat)
    return out.reshape(target)              # free metadata reshape


if __name__ == "__main__":
    key = jax.random.PRNGKey(0)
    k1, k2, k3, k4, k5 = jax.random.split(key, 5)

    # 1) Main case: small NCHW-like input, View(shape=(2, -1)).
    x = jax.random.normal(k1, (2, 4, 16, 16), dtype=jnp.float32)
    y = jax.block_until_ready(pallas_view(x, (2, -1)))
    ref = jnp.reshape(x, (2, 4 * 16 * 16))
    assert y.shape == ref.shape and y.dtype == ref.dtype
    assert bool(jnp.array_equal(y, ref))

    # 2) bf16 input (dtype-aware sublane handling).
    xb = jax.random.normal(k2, (2, 4, 16, 16), dtype=jnp.bfloat16)
    yb = jax.block_until_ready(pallas_view(xb, (8, -1)))
    refb = jnp.reshape(xb, (8, 256))
    assert yb.shape == refb.shape and yb.dtype == refb.dtype
    assert bool(jnp.array_equal(yb, refb))

    # 3) Small ragged numel (105 elements) -> single-chunk HBM->HBM DMA path.
    xr = jax.random.normal(k3, (3, 5, 7), dtype=jnp.float32)
    yr = jax.block_until_ready(pallas_view(xr, (-1, 7)))
    refr = jnp.reshape(xr, (15, 7))
    assert yr.shape == refr.shape and yr.dtype == refr.dtype
    assert bool(jnp.array_equal(yr, refr))

    # 4) Larger ragged numel (~3 MiB, not a multiple of 128) -> multi-chunk DMA.
    xl = jax.random.normal(k4, (769, 1023), dtype=jnp.float32)
    yl = jax.block_until_ready(pallas_view(xl, (-1,)))
    refl = jnp.reshape(xl, (-1,))
    assert yl.shape == refl.shape and yl.dtype == refl.dtype
    assert bool(jnp.array_equal(yl, refl))

    # 5) Aligned multi-block grid (small block_bytes override -> 2 grid steps).
    xg = jax.random.normal(k5, (512, 1024), dtype=jnp.float32)
    yg = jax.block_until_ready(pallas_view(xg, (256, -1), block_bytes=256 * 1024))
    refg = jnp.reshape(xg, (256, 2048))
    assert yg.shape == refg.shape and yg.dtype == refg.dtype
    assert bool(jnp.array_equal(yg, refg))

    print("KERNEL_OK")
</pallas_src>

<mosaic_0001>
module attributes {stable_mosaic.version = 11 : i64} {
  func.func @_copy_kernel(%arg0: i32, %arg1: memref<1x2048xf32, #tpu.memory_space<vmem>>, %arg2: memref<1x2048xf32, #tpu.memory_space<vmem>>) attributes {dimension_semantics = [#tpu.dimension_semantics<parallel>], iteration_bounds = array<i64: 1>, scalar_prefetch = 0 : i64, scratch_operands = 0 : i64, tpu.core_type = #tpu.core_type<tc>, window_params = [{transform_indices = @transform_0, window_bounds = array<i64: 1, 2048>}, {transform_indices = @transform_1, window_bounds = array<i64: 1, 2048>}]} {
    %c0 = arith.constant 0 : index
    %c0_0 = arith.constant 0 : index
    %0 = vector.load %arg1[%c0, %c0_0] : memref<1x2048xf32, #tpu.memory_space<vmem>>, vector<1x2048xf32>
    %c0_1 = arith.constant 0 : index
    %c0_2 = arith.constant 0 : index
    %1 = vector.load %arg2[%c0_1, %c0_2] : memref<1x2048xf32, #tpu.memory_space<vmem>>, vector<1x2048xf32>
    tpu.vector_store %arg2[%c0_1, %c0_2], %0 {strides = array<i32>} : memref<1x2048xf32, #tpu.memory_space<vmem>>, vector<1x2048xf32>,
    return
  }
  func.func @transform_0(%arg0: i32) -> (i32, i32) {
    %c0_i32 = arith.constant 0 : i32
    %c0_i32_0 = arith.constant 0 : i32
    return %arg0, %c0_i32 : i32, i32
  }
  func.func @transform_1(%arg0: i32) -> (i32, i32) {
    %c0_i32 = arith.constant 0 : i32
    %c0_i32_0 = arith.constant 0 : i32
    return %arg0, %c0_i32 : i32, i32
  }
}

</mosaic_0001>

<bundles_post_ra>
// kernel: tpu_custom_call.1
= control target key start
LH: loop header
LB: loop body
LE: loop exit
PB: predicated region body
PF: predicated region fallthrough
CT: control target
= control target key end

     0   :  { %6 = vsyncpa [#allocation3], 0  ;;  %s104_s0 = inlined_call_operand.hbm [shape: f32[1,2048], index: 0, kind: input, shape index: {}]   ;;  %s105_s1 = inlined_call_operand.hbm [shape: f32[1,2048], index: 1, kind: output, shape index: {}]  }
   0x1   :  { %7 = vsyncpa [#allocation4], 0  ;;  %s86_s6 = smov [#allocation2]  }
   0x2   :  { %s14_s7 = sshll.u32 %s86_s6, 4  ;;  %s15_s7 = int_to_ptr.vmem [resolvable:$true] %s14_s7 }
   0x3   :  { %s50_s8 = scalar_lea.vmem %s15_s7, 256  ;;  %p55_p1 = scmp.lt.s32.totalorder %s15_s7, %s15_s7 }
   0x4   :  { %p51_p0 = scmp.ne.s32.totalorder %s15_s7, %s50_s8  ;;  %p56_p2 = scmp.lt.s32.totalorder %s50_s8, %s50_s8 }
   0x6   :  { %p57_p3 = por %p56_p2, %p55_p1 }
   0x8   :  { %p58_p4 = pnand %p57_p3, %p51_p0 }
   0xa   :  { %61 = shalt.err (!%p58_p4)
}
   0xb   :  { %17 = dma.hbm_to_vmem [thread:$0]  %s104_s0, 256, %s15_s7, [#allocation3]  }
   0xc   :  { %82 = dma.done.wait [#allocation3], 256  }
   0xd   :  { %83 = vsyncadd [#allocation3], 4294967040  ;;  %s87_s11 = smov [#allocation5]   ;;  %v21_v0 = vld [vmem:[#allocation2] sm:$0xff]  ;;  %v22_v1 = vld [vmem:[#allocation2 + $0x8] sm:$0xff] }
   0xe   :  { %s31_s12 = sshll.u32 %s87_s11, 4  ;;  %23 = vst [vmem:[#allocation5] sm:$0xff] %v21_v0  ;;  %24 = vst [vmem:[#allocation5 + $0x8] sm:$0xff] %v22_v1  ;;  %s32_s12 = int_to_ptr.vmem [resolvable:$true] %s31_s12 }
   0xf   :  { %s62_s13 = scalar_lea.vmem %s32_s12, 256  ;;  %p67_p6 = scmp.lt.s32.totalorder %s32_s12, %s32_s12 }
  0x10   :  { %p63_p5 = scmp.ne.s32.totalorder %s32_s12, %s62_s13  ;;  %p68_p7 = scmp.lt.s32.totalorder %s62_s13, %s62_s13 }
  0x12   :  { %p69_p8 = por %p68_p7, %p67_p6 }
  0x14   :  { %p70_p9 = pnand %p69_p8, %p63_p5 }
  0x16   :  { %73 = shalt.err (!%p70_p9)
}
  0x17   :  { %34 = dma.vmem_to_hbm [thread:$0]  %s32_s12, 256, %s105_s1, [#allocation4]  }
  0x18   :  { %84 = dma.done.wait [#allocation4], 256  }
  0x19   :  { %85 = vsyncadd [#allocation4], 4294967040 }
  0x1a   :  { %38 = vsyncpa [#allocation3], 1 }
  0x1b   :  { %39 = vsyncpa [#allocation4], 1 }

</bundles_post_ra>
